<compile_context>
chip_gen: v7x
topology: tpu7x:2x2x1
jax: 0.10.0
libtpu: 0.0.40
codegen_flags: <defaults>
</compile_context>

<pallas_src>
import functools

import jax
import jax.numpy as jnp
from jax.experimental import pallas as pl
from jax.experimental.pallas import tpu as pltpu


def _round_up(x, m):
    return ((x + m - 1) // m) * m


def _loss_kernel(classes_ref, bboxes_ref, targets_ref, out_ref, acc_ref,
                 *, n, c, tn, k_per):
    """One (tn, c) row-tile of the fused soft-target CE + MSE loss.

    Grid is (num_parallel, k_per): axis 0 splits row-tiles across TensorCores
    ("parallel"; a plain outer loop on 1-TC chips), axis 1 is the "arbitrary"
    reduction over row-tiles.  acc_ref is a (tn, c) f32 elementwise running
    sum (no per-step cross-sublane reduction); it is zeroed at k == 0 and
    collapsed to the scalar output only at k == last.
    """
    p_id = pl.program_id(0)
    k_id = pl.program_id(1)

    @pl.when(k_id == 0)
    def _():
        acc_ref[...] = jnp.zeros_like(acc_ref)

    x = classes_ref[...].astype(jnp.float32)   # (tn, c) logits
    t = targets_ref[...].astype(jnp.float32)   # (tn, c) soft targets
    b = bboxes_ref[...].astype(jnp.float32)    # (tn, c) bbox predictions

    # Soft-target CE fused into one elementwise expression:
    #   ce_row = -sum_c t*(x - m - lse) = sum_c t*((m + lse) - x)
    # MSE pre-scaled by 1/c so a single accumulator carries CE + MSE.
    m = jnp.max(x, axis=-1, keepdims=True)                           # (tn, 1)
    lse = jnp.log(jnp.sum(jnp.exp(x - m), axis=-1, keepdims=True))   # (tn, 1)
    d = b - t
    e = t * ((m + lse) - x) + d * d * (1.0 / c)                      # (tn, c)

    # Only the tile that overhangs the true batch needs masking; interior
    # tiles accumulate directly (mask hoisted off the steady-state path).
    row0 = (p_id * k_per + k_id) * tn
    is_interior = row0 + tn <= n

    @pl.when(is_interior)
    def _():
        acc_ref[...] += e

    @pl.when(jnp.logical_not(is_interior))
    def _():
        rows = jax.lax.broadcasted_iota(jnp.int32, (tn, c), 0) + row0
        # select() blocks any NaN/Inf from uninitialized pad rows (and from a
        # fully out-of-range duplicated block in the odd-tile megacore case).
        acc_ref[...] += jnp.where(rows < n, e, 0.0)

    @pl.when(k_id == pl.num_programs(1) - 1)
    def _():
        # Single cross-lane/sublane reduction + scaling at finalize:
        #   sum(ce_row)/n + sum((b - t)^2)/(n*c)
        out_ref[...] = jnp.sum(acc_ref[...], keepdims=True) * (1.0 / n)


def _vmem_capacity_bytes():
    """Per-TensorCore VMEM capacity (v5e/v6e: 128 MiB, v7x: 64 MiB)."""
    try:
        info = pltpu.get_tpu_info()
        cap = getattr(info, "vmem_capacity_bytes", None)
        if cap:
            return int(cap)
    except Exception:
        pass
    return 64 * 1024 * 1024   # conservative floor (v7x)


def _num_tensorcores():
    """TensorCores addressable by one pallas_call (megacore / multi-TC parts)."""
    try:
        info = pltpu.get_tpu_info()
        for attr in ("num_tensorcores", "tensorcore_count", "num_cores",
                     "cores_per_chip", "num_cores_per_chip"):
            v = getattr(info, attr, None)
            if isinstance(v, int) and v > 0:
                return v
    except Exception:
        pass
    try:
        kind = jax.devices()[0].device_kind.lower()
    except Exception:
        return 1
    # v4 / v5p megacore and v7x have 2 TCs; v5e ("v5 lite") / v6e have 1.
    if any(tag in kind for tag in ("v4", "v5p", "v7", "tpu7")):
        return 2
    return 1


def _pick_tile_rows(n, c, itemsize, budget_bytes):
    """Rows per tile so 3 inputs x 2 pipeline buffers + f32 intermediates fit
    `budget_bytes` of VMEM.  Uses the lane-padded width round_up(c, 128)
    (a (tn, 32) f32 block really occupies tn*512 B of VMEM) and the dtype's
    sublane packing granularity (f32: 8, bf16: 16, int8/fp8: 32 rows)."""
    gran = max(8, 32 // itemsize)
    if n <= gran:
        return n                                   # single full-extent tile
    c_pad = _round_up(c, 128)
    # 3 inputs x 2 pipeline buffers at the input width, plus ~8 live f32
    # (row, c_pad) values inside the kernel (upcasts, exp, fused term, acc...).
    bytes_per_row = c_pad * (3 * 2 * itemsize + 8 * 4)
    tn = budget_bytes // bytes_per_row
    tn = max(gran, (tn // gran) * gran)
    return min(tn, (n // gran) * gran)             # keep tn a sublane multiple


def object_detection_loss(classes, bboxes, targets, *, tile_rows=None):
    """Scalar loss = CrossEntropy(classes, targets) + MSE(bboxes, targets).

    Inputs may be f32 or bf16 (bf16 halves HBM traffic of this bandwidth-bound
    reduction); all math and accumulation run in f32 inside the kernel.
    """
    assert classes.shape == bboxes.shape == targets.shape
    assert classes.ndim == 2
    n, c = classes.shape

    itemsize = max(jnp.dtype(a.dtype).itemsize for a in (classes, bboxes, targets))

    vmem_cap = _vmem_capacity_bytes()
    block_budget = int(vmem_cap * 0.65)     # ~42 MiB on v7x, ~83 MiB on v5e/v6e
    vmem_limit = int(vmem_cap * 0.90)

    if tile_rows is not None:
        tn = max(1, min(int(tile_rows), n))
    else:
        tn = _pick_tile_rows(n, c, itemsize, block_budget)

    k_total = pl.cdiv(n, tn)
    # Split row-tiles across both TensorCores whenever there is more than one
    # tile and the part actually has 2 TCs.  Odd k_total needs no special case:
    # the duplicated trailing block index is clamped in the index_map and its
    # rows (>= n) are zeroed by the in-kernel edge mask.
    num_parallel = 2 if (_num_tensorcores() >= 2 and k_total >= 2) else 1
    k_per = pl.cdiv(k_total, num_parallel)
    last_block = k_total - 1

    def row_block(p, k):
        return (jnp.minimum(p * k_per + k, last_block), 0)

    kernel = functools.partial(_loss_kernel, n=n, c=c, tn=tn, k_per=k_per)

    partials = pl.pallas_call(
        kernel,
        out_shape=jax.ShapeDtypeStruct((num_parallel, 1), jnp.float32),
        grid=(num_parallel, k_per),
        in_specs=[
            pl.BlockSpec((tn, c), row_block),
            pl.BlockSpec((tn, c), row_block),
            pl.BlockSpec((tn, c), row_block),
        ],
        out_specs=pl.BlockSpec((1, 1), lambda p, k: (p, 0)),
        scratch_shapes=[pltpu.VMEM((tn, c), jnp.float32)],
        compiler_params=pltpu.CompilerParams(
            dimension_semantics=("parallel", "arbitrary"),
            vmem_limit_bytes=vmem_limit,
        ),
    )(classes, bboxes, targets)
    return jnp.sum(partials)


def _reference_loss(classes, bboxes, targets):
    """Pure-JAX reference (torch CE-with-soft-targets + MSE), f32 math."""
    logp = jax.nn.log_softmax(classes.astype(jnp.float32), axis=-1)
    ce = jnp.mean(-jnp.sum(targets.astype(jnp.float32) * logp, axis=-1))
    mse = jnp.mean((bboxes.astype(jnp.float32) - targets.astype(jnp.float32)) ** 2)
    return ce + mse


if __name__ == "__main__":
    key = jax.random.PRNGKey(0)
    keys = jax.random.split(key, 9)

    # ---- Test 1: small shape, single-tile path ----
    N, C = 8, 32
    classes = jax.random.normal(keys[0], (N, C), dtype=jnp.float32)
    bboxes = jax.random.normal(keys[1], (N, C), dtype=jnp.float32)
    targets = jax.nn.softmax(jax.random.normal(keys[2], (N, C), dtype=jnp.float32), axis=-1)

    loss = jax.block_until_ready(object_detection_loss(classes, bboxes, targets))
    ref = jax.block_until_ready(_reference_loss(classes, bboxes, targets))
    assert jnp.allclose(loss, ref, rtol=1e-5, atol=1e-5), (loss, ref)

    # ---- Test 2: multi-tile path, padded edge-row masking, 2-TC split (if present) ----
    N2, C2 = 44, 32   # not a multiple of the 8-row tile -> masked last tile
    classes2 = jax.random.normal(keys[3], (N2, C2), dtype=jnp.float32)
    bboxes2 = jax.random.normal(keys[4], (N2, C2), dtype=jnp.float32)
    targets2 = jax.nn.softmax(jax.random.normal(keys[5], (N2, C2), dtype=jnp.float32), axis=-1)

    loss2 = jax.block_until_ready(
        object_detection_loss(classes2, bboxes2, targets2, tile_rows=8))
    ref2 = jax.block_until_ready(_reference_loss(classes2, bboxes2, targets2))
    assert jnp.allclose(loss2, ref2, rtol=1e-5, atol=1e-5), (loss2, ref2)

    # ---- Test 3: bf16 inputs (half the HBM traffic), f32 math inside the kernel ----
    N3, C3 = 64, 32
    classes3 = jax.random.normal(keys[6], (N3, C3), dtype=jnp.float32).astype(jnp.bfloat16)
    bboxes3 = jax.random.normal(keys[7], (N3, C3), dtype=jnp.float32).astype(jnp.bfloat16)
    targets3 = jax.nn.softmax(
        jax.random.normal(keys[8], (N3, C3), dtype=jnp.float32), axis=-1).astype(jnp.bfloat16)

    loss3 = jax.block_until_ready(object_detection_loss(classes3, bboxes3, targets3))
    ref3 = jax.block_until_ready(_reference_loss(classes3, bboxes3, targets3))
    assert jnp.allclose(loss3, ref3, rtol=1e-3, atol=1e-3), (loss3, ref3)

    print("KERNEL_OK")
</pallas_src>

<mosaic_0001>
module attributes {stable_mosaic.version = 11 : i64} {
  func.func @_loss_kernel(%arg0: i32, %arg1: i32, %arg2: memref<8x32xf32, #tpu.memory_space<vmem>>, %arg3: memref<8x32xf32, #tpu.memory_space<vmem>>, %arg4: memref<8x32xf32, #tpu.memory_space<vmem>>, %arg5: memref<1x1xf32, #tpu.memory_space<vmem>>, %arg6: memref<8x32xf32, #tpu.memory_space<vmem>>) attributes {dimension_semantics = [#tpu.dimension_semantics<parallel>, #tpu.dimension_semantics<arbitrary>], iteration_bounds = array<i64: 1, 1>, scalar_prefetch = 0 : i64, scratch_operands = 1 : i64, tpu.core_type = #tpu.core_type<tc>, window_params = [{transform_indices = @transform_0, window_bounds = array<i64: 8, 32>}, {transform_indices = @transform_1, window_bounds = array<i64: 8, 32>}, {transform_indices = @transform_2, window_bounds = array<i64: 8, 32>}, {transform_indices = @transform_3, window_bounds = array<i64: 1, 1>}]} {
    %c0_i32 = arith.constant 0 : i32
    %0 = arith.cmpi eq, %arg1, %c0_i32 : i32
    %1 = arith.extui %0 : i1 to i32
    %c0_i32_0 = arith.constant 0 : i32
    %2 = arith.cmpi ne, %1, %c0_i32_0 : i32
    scf.if %2 {
      %cst_14 = arith.constant 0.000000e+00 : f32
      %36 = vector.broadcast %cst_14 : f32 to vector<8x32xf32>
      %c0_15 = arith.constant 0 : index
      %c0_16 = arith.constant 0 : index
      %37 = vector.load %arg6[%c0_15, %c0_16] : memref<8x32xf32, #tpu.memory_space<vmem>>, vector<8x32xf32>
      tpu.vector_store %arg6[%c0_15, %c0_16], %36 {strides = array<i32>} : memref<8x32xf32, #tpu.memory_space<vmem>>, vector<8x32xf32>,
    } else {
    }
    %c0 = arith.constant 0 : index
    %c0_1 = arith.constant 0 : index
    %3 = vector.load %arg2[%c0, %c0_1] : memref<8x32xf32, #tpu.memory_space<vmem>>, vector<8x32xf32>
    %c0_2 = arith.constant 0 : index
    %c0_3 = arith.constant 0 : index
    %4 = vector.load %arg4[%c0_2, %c0_3] : memref<8x32xf32, #tpu.memory_space<vmem>>, vector<8x32xf32>
    %c0_4 = arith.constant 0 : index
    %c0_5 = arith.constant 0 : index
    %5 = vector.load %arg3[%c0_4, %c0_5] : memref<8x32xf32, #tpu.memory_space<vmem>>, vector<8x32xf32>
    %cst = arith.constant dense<0xFF800000> : vector<8xf32>
    %6 = vector.multi_reduction <maximumf>, %3, %cst [1] : vector<8x32xf32> to vector<8xf32>
    %7 = vector.shape_cast %6 : vector<8xf32> to vector<8x1xf32>
    %8 = vector.broadcast %7 : vector<8x1xf32> to vector<8x32xf32>
    %9 = arith.subf %3, %8 : vector<8x32xf32>
    %10 = math.exp %9 : vector<8x32xf32>
    %cst_6 = arith.constant dense<0.000000e+00> : vector<8xf32>
    %11 = vector.multi_reduction <add>, %10, %cst_6 [1] : vector<8x32xf32> to vector<8xf32>
    %12 = vector.shape_cast %11 : vector<8xf32> to vector<8x1xf32>
    %13 = math.log %12 : vector<8x1xf32>
    %14 = arith.subf %5, %4 : vector<8x32xf32>
    %15 = arith.addf %7, %13 : vector<8x1xf32>
    %16 = vector.broadcast %15 : vector<8x1xf32> to vector<8x32xf32>
    %17 = arith.subf %16, %3 : vector<8x32xf32>
    %18 = arith.mulf %4, %17 : vector<8x32xf32>
    %19 = arith.mulf %14, %14 : vector<8x32xf32>
    %cst_7 = arith.constant 3.125000e-02 : f32
    %20 = vector.broadcast %cst_7 : f32 to vector<8x32xf32>
    %21 = arith.mulf %19, %20 : vector<8x32xf32>
    %22 = arith.addf %18, %21 : vector<8x32xf32>
    %c1_i32 = arith.constant 1 : i32
    %23 = arith.muli %arg0, %c1_i32 : i32
    %24 = arith.addi %23, %arg1 : i32
    %c8_i32 = arith.constant 8 : i32
    %25 = arith.muli %24, %c8_i32 : i32
    %c8_i32_8 = arith.constant 8 : i32
    %26 = arith.addi %25, %c8_i32_8 : i32
    %c8_i32_9 = arith.constant 8 : i32
    %27 = arith.cmpi sle, %26, %c8_i32_9 : i32
    %28 = arith.extui %27 : i1 to i32
    %c0_i32_10 = arith.constant 0 : i32
    %29 = arith.cmpi ne, %28, %c0_i32_10 : i32
    scf.if %29 {
      %c0_14 = arith.constant 0 : index
      %c0_15 = arith.constant 0 : index
      %36 = vector.load %arg6[%c0_14, %c0_15] : memref<8x32xf32, #tpu.memory_space<vmem>>, vector<8x32xf32>
      %37 = arith.addf %36, %22 : vector<8x32xf32>
      %c0_16 = arith.constant 0 : index
      %c0_17 = arith.constant 0 : index
      %38 = vector.load %arg6[%c0_16, %c0_17] : memref<8x32xf32, #tpu.memory_space<vmem>>, vector<8x32xf32>
      tpu.vector_store %arg6[%c0_16, %c0_17], %37 {strides = array<i32>} : memref<8x32xf32, #tpu.memory_space<vmem>>, vector<8x32xf32>,
    } else {
    }
    %true = arith.constant true
    %30 = arith.xori %27, %true : i1
    %31 = arith.extui %30 : i1 to i32
    %c0_i32_11 = arith.constant 0 : i32
    %32 = arith.cmpi ne, %31, %c0_i32_11 : i32
    scf.if %32 {
      %36 = tpu.iota {dimensions = array<i32: 0>} : vector<8x32xi32>
      %37 = vector.broadcast %25 : i32 to vector<8x32xi32>
      %38 = arith.addi %36, %37 : vector<8x32xi32>
      %c0_14 = arith.constant 0 : index
      %c0_15 = arith.constant 0 : index
      %39 = vector.load %arg6[%c0_14, %c0_15] : memref<8x32xf32, #tpu.memory_space<vmem>>, vector<8x32xf32>
      %c8_i32_16 = arith.constant 8 : i32
      %40 = vector.broadcast %c8_i32_16 : i32 to vector<8x32xi32>
      %41 = arith.cmpi slt, %38, %40 : vector<8x32xi32>
      %cst_17 = arith.constant 0.000000e+00 : f32
      %42 = vector.broadcast %cst_17 : f32 to vector<8x32xf32>
      %43 = arith.select %41, %22, %42 : vector<8x32xi1>, vector<8x32xf32>
      %44 = arith.addf %39, %43 : vector<8x32xf32>
      %c0_18 = arith.constant 0 : index
      %c0_19 = arith.constant 0 : index
      %45 = vector.load %arg6[%c0_18, %c0_19] : memref<8x32xf32, #tpu.memory_space<vmem>>, vector<8x32xf32>
      tpu.vector_store %arg6[%c0_18, %c0_19], %44 {strides = array<i32>} : memref<8x32xf32, #tpu.memory_space<vmem>>, vector<8x32xf32>,
    } else {
    }
    %c0_i32_12 = arith.constant 0 : i32
    %33 = arith.cmpi eq, %arg1, %c0_i32_12 : i32
    %34 = arith.extui %33 : i1 to i32
    %c0_i32_13 = arith.constant 0 : i32
    %35 = arith.cmpi ne, %34, %c0_i32_13 : i32
    scf.if %35 {
      %c0_14 = arith.constant 0 : index
      %c0_15 = arith.constant 0 : index
      %36 = vector.load %arg6[%c0_14, %c0_15] : memref<8x32xf32, #tpu.memory_space<vmem>>, vector<8x32xf32>
      %37 = vector.shape_cast %36 : vector<8x32xf32> to vector<1x8x32xf32>
      %cst_16 = arith.constant dense<0.000000e+00> : vector<1xf32>
      %38 = vector.multi_reduction <add>, %37, %cst_16 [1, 2] : vector<1x8x32xf32> to vector<1xf32>
      %39 = vector.shape_cast %38 : vector<1xf32> to vector<1x1x1xf32>
      %40 = vector.extract %39[0, 0, 0] : f32 from vector<1x1x1xf32>
      %41 = vector.broadcast %40 : f32 to vector<1x1xf32>
      %cst_17 = arith.constant 1.250000e-01 : f32
      %42 = vector.broadcast %cst_17 : f32 to vector<1x1xf32>
      %43 = arith.mulf %41, %42 : vector<1x1xf32>
      %c0_18 = arith.constant 0 : index
      %c0_19 = arith.constant 0 : index
      %44 = vector.load %arg5[%c0_18, %c0_19] : memref<1x1xf32, #tpu.memory_space<vmem>>, vector<1x1xf32>
      tpu.vector_store %arg5[%c0_18, %c0_19], %43 {strides = array<i32>} : memref<1x1xf32, #tpu.memory_space<vmem>>, vector<1x1xf32>,
    } else {
    }
    return
  }
  func.func @transform_0(%arg0: i32, %arg1: i32) -> (i32, i32) {
    %c1_i32 = arith.constant 1 : i32
    %0 = arith.muli %arg0, %c1_i32 : i32
    %1 = arith.addi %0, %arg1 : i32
    %c0_i32 = arith.constant 0 : i32
    %2 = arith.minsi %1, %c0_i32 : i32
    %c0_i32_0 = arith.constant 0 : i32
    %c0_i32_1 = arith.constant 0 : i32
    return %2, %c0_i32_0 : i32, i32
  }
  func.func @transform_1(%arg0: i32, %arg1: i32) -> (i32, i32) {
    %c1_i32 = arith.constant 1 : i32
    %0 = arith.muli %arg0, %c1_i32 : i32
    %1 = arith.addi %0, %arg1 : i32
    %c0_i32 = arith.constant 0 : i32
    %2 = arith.minsi %1, %c0_i32 : i32
    %c0_i32_0 = arith.constant 0 : i32
    %c0_i32_1 = arith.constant 0 : i32
    return %2, %c0_i32_0 : i32, i32
  }
  func.func @transform_2(%arg0: i32, %arg1: i32) -> (i32, i32) {
    %c1_i32 = arith.constant 1 : i32
    %0 = arith.muli %arg0, %c1_i32 : i32
    %1 = arith.addi %0, %arg1 : i32
    %c0_i32 = arith.constant 0 : i32
    %2 = arith.minsi %1, %c0_i32 : i32
    %c0_i32_0 = arith.constant 0 : i32
    %c0_i32_1 = arith.constant 0 : i32
    return %2, %c0_i32_0 : i32, i32
  }
  func.func @transform_3(%arg0: i32, %arg1: i32) -> (i32, i32) {
    %c0_i32 = arith.constant 0 : i32
    %c0_i32_0 = arith.constant 0 : i32
    return %arg0, %c0_i32 : i32, i32
  }
}

</mosaic_0001>

<bundles_post_ra>
// kernel: tpu_custom_call.1
= control target key start
LH: loop header
LB: loop body
LE: loop exit
PB: predicated region body
PF: predicated region fallthrough
CT: control target
= control target key end

     0   :  { %8 = vsyncpa [#allocation4], 0  ;;  %s348_s0 = inlined_call_operand.hbm [shape: f32[8,32], index: 0, kind: input, shape index: {}]   ;;  %s349_s1 = inlined_call_operand.hbm [shape: f32[8,32], index: 1, kind: input, shape index: {}]   ;;  %s350_s2 = inlined_call_operand.hbm [shape: f32[8,32], index: 2, kind: input, shape index: {}]   ;;  %s351_s3 = inlined_call_operand.hbm [shape: f32[1,1], index: 3, kind: output, shape index: {}]  }
   0x1   :  { %9 = vsyncpa [#allocation7], 0 }
   0x2   :  { %10 = vsyncpa [#allocation5], 0  ;;  %s270_s12 = smov [#allocation6]   ;;  %s271_s14 = smov [#allocation3]  }
   0x3   :  { %s37_s13 = sshll.u32 %s270_s12, 4  ;;  %s22_s15 = sshll.u32 %s271_s14, 4  ;;  %s38_s13 = int_to_ptr.vmem [resolvable:$true] %s37_s13  ;;  %s23_s15 = int_to_ptr.vmem [resolvable:$true] %s22_s15 }
   0x4   :  { %s176_s18 = scalar_lea.hbm %s349_s1, 128 }
   0x5   :  { %p177_p0 = scmp.ne.s32.totalorder %s349_s1, %s176_s18  ;;  %p180_p1 = scmp.lt.u32.totalorder %s176_s18, %s349_s1 }
   0x7   :  { %p182_p2 = pnand %p180_p1, %p177_p0 }
   0x9   :  { %185 = shalt.err (!%p182_p2)
}
   0xa   :  { %s186_s23 = scalar_lea.vmem %s38_s13, 128  ;;  %p191_p4 = scmp.lt.s32.totalorder %s38_s13, %s38_s13 }
   0xb   :  { %p187_p3 = scmp.ne.s32.totalorder %s38_s13, %s186_s23  ;;  %p192_p5 = scmp.lt.s32.totalorder %s186_s23, %s186_s23 }
   0xd   :  { %p193_p6 = por %p192_p5, %p191_p4 }
   0xf   :  { %p194_p7 = pnand %p193_p6, %p187_p3 }
  0x11   :  { %197 = shalt.err (!%p194_p7)
}
  0x12   :  { %40 = dma.hbm_to_vmem [thread:$0]  %s349_s1, 128, %s38_s13, [#allocation7]  }
  0x13   :  { %s198_s28 = scalar_lea.hbm %s348_s0, 128 }
  0x14   :  { %p199_p8 = scmp.ne.s32.totalorder %s348_s0, %s198_s28  ;;  %p202_p9 = scmp.lt.u32.totalorder %s198_s28, %s348_s0 }
  0x16   :  { %p204_p10 = pnand %p202_p9, %p199_p8 }
  0x18   :  { %207 = shalt.err (!%p204_p10)
}
  0x19   :  { %s208_s6 = scalar_lea.vmem %s23_s15, 128  ;;  %p213_p12 = scmp.lt.s32.totalorder %s23_s15, %s23_s15 }
  0x1a   :  { %p209_p11 = scmp.ne.s32.totalorder %s23_s15, %s208_s6  ;;  %p214_p13 = scmp.lt.s32.totalorder %s208_s6, %s208_s6 }
  0x1c   :  { %p215_p0 = por %p214_p13, %p213_p12 }
  0x1e   :  { %p216_p1 = pnand %p215_p0, %p209_p11 }
  0x20   :  { %219 = shalt.err (!%p216_p1)
}
  0x21   :  { %25 = dma.hbm_to_vmem [thread:$0]  %s348_s0, 128, %s23_s15, [#allocation4]  }
  0x22   :  { %s272_s8 = smov [#allocation8]   ;;  %s220_s12 = scalar_lea.hbm %s350_s2, 128 }
  0x23   :  { %s52_s9 = sshll.u32 %s272_s8, 4  ;;  %p221_p2 = scmp.ne.s32.totalorder %s350_s2, %s220_s12  ;;  %s53_s9 = int_to_ptr.vmem [resolvable:$true] %s52_s9 }
  0x24   :  { %p224_p3 = scmp.lt.u32.totalorder %s220_s12, %s350_s2 }
  0x26   :  { %p226_p4 = pnand %p224_p3, %p221_p2 }
  0x28   :  { %229 = shalt.err (!%p226_p4)
}
  0x29   :  { %s230_s18 = scalar_lea.vmem %s53_s9, 128  ;;  %p235_p6 = scmp.lt.s32.totalorder %s53_s9, %s53_s9 }
  0x2a   :  { %p231_p5 = scmp.ne.s32.totalorder %s53_s9, %s230_s18  ;;  %p236_p7 = scmp.lt.s32.totalorder %s230_s18, %s230_s18 }
  0x2c   :  { %p237_p8 = por %p236_p7, %p235_p6 }
  0x2e   :  { %p238_p9 = pnand %p237_p8, %p231_p5 }
  0x30   :  { %241 = shalt.err (!%p238_p9)
}
  0x31   :  { %55 = dma.hbm_to_vmem [thread:$0]  %s350_s2, 128, %s53_s9, [#allocation7]  }
  0x32   :  { %264 = dma.done.wait [#allocation4], 128  }
  0x33   :  { %265 = vsyncadd [#allocation4], 4294967168 }
  0x34   :  { %266 = dma.done.wait [#allocation7], 256  }
  0x35   :  { %267 = vsyncadd [#allocation7], 4294967040  ;;  %vm78_vm0 = vcmask 261120   ;;  %v273_v0 = vmov 0.0   ;;  %v80_v1 = vld [vmem:[#allocation3] sm:$0xff]  ;;  %v81_v9 = vld [vmem:[#allocation8] sm:$0xff] }
  0x36   :  { %79 = vst.msk [vmem:[#allocation2] sm:$0xff] %vm78_vm0, %v273_v0  ;;  %v84_v2 = vsel %vm78_vm0, %v80_v1, -inf  ;;  %v82_v10 = vld [vmem:[#allocation6] sm:$0xff]  ;;  %s274_s2 = smov [#allocation9]   ;;  %vm141_vm1 = vcmask 0  }
  0x37   :  { %85 = vmax.xlane.f32.xlu0 %v84_v2  ;;  %v95_v11 = vsub.f32 %v82_v10, %v81_v9  ;;  %s149_s19 = sshll.u32 %s274_s2, 4  ;;  %s150_s19 = int_to_ptr.vmem [resolvable:$true] %s149_s19 }
  0x38   :  { %s242_s21 = scalar_lea.vmem %s150_s19, 16  ;;  %s246_s22 = scalar_lea.vmem %s150_s19, 32 }
  0x39   :  { %v99_v13 = vmul.f32 %v95_v11, %v95_v11  ;;  %p243_p10 = scmp.ne.s32.totalorder %s150_s19, %s242_s21  ;;  %p247_p11 = scmp.lt.s32.totalorder %s150_s19, %s150_s19 }
  0x3a   :  { %p248_p12 = scmp.lt.s32.totalorder %s246_s22, %s242_s21 }
  0x3b   :  { %v100_v16 = vmul.f32 0.03125, %v99_v13 }
  0x3c   :  { %p249_p13 = por %p248_p12, %p247_p11 }
  0x3d   :  { %v109_v19 = vld [vmem:[#allocation2] sm:$0xff] }
  0x3e   :  { %p250_p0 = pnand %p249_p13, %p243_p10 }
  0xc4   :  { %v86_v3 = vpop.xlane.xlu0 %85 }
  0xc5   :  { %v87_v4 = vsub.f32 %v80_v1, %v86_v3 }
  0xc7   :  { %v88_v5 = vmul.f32 1.442695, %v87_v4 }
  0xc9   :  { %172 = vpow2.f32 %v88_v5 }
  0xd3   :  { %v173_v6 = vpop.eup %172 }
  0xd4   :  { %v90_v7 = vsel %vm78_vm0, %v173_v6, 0.0 }
  0xd5   :  { %91 = vadd.xlane.f32.xlu0 %v90_v7 }
 0x162   :  { %v92_v8 = vpop.xlane.xlu0 %91 }
 0x163   :  { %174 = vlog2.f32 %v92_v8 }
 0x16d   :  { %v175_v12 = vpop.eup %174 }
 0x16e   :  { %v94_v14 = vmul.f32 0.6931472, %v175_v12 }
 0x170   :  { %v96_v15 = vadd.f32 %v94_v14, %v86_v3 }
 0x172   :  { %v97_v17 = vsub.f32 %v96_v15, %v80_v1 }
 0x174   :  { %v98_v18 = vmul.f32 %v97_v17, %v81_v9 }
 0x176   :  { %v101_v20 = vadd.f32 %v100_v16, %v98_v18 }
 0x178   :  { %v110_v21 = vadd.f32 %v109_v19, %v101_v20 }
 0x17a   :  { %111 = vst.msk [vmem:[#allocation2] sm:$0xff] %vm78_vm0, %v110_v21 }
 0x181   :  { %v128_v22 = vld [vmem:[#allocation2] sm:$0xff] }
 0x182   :  { %v129_v23 = vsel %vm78_vm0, %v128_v22, 0.0 }
 0x183   :  { %130 = vadd.xlane.f32.xlu1 %v129_v23 }
 0x210   :  { %v131_v24 = vpop.xlane.xlu1 %130 }
 0x211   :  { %v132_v25 = vrot.slane %v131_v24, 4 }
 0x213   :  { %v133_v26 = vadd.f32 %v132_v25, %v131_v24 }
 0x215   :  { %v134_v27 = vrot.slane %v133_v26, 2 }
 0x217   :  { %v135_v28 = vadd.f32 %v134_v27, %v133_v26 }
 0x219   :  { %v136_v29 = vrot.slane %v135_v28, 1 }
 0x21b   :  { %v137_v30 = vadd.f32 %v136_v29, %v135_v28 }
 0x21d   :  { %165 = vpush %v137_v30 }
 0x24e   :  { %s166_s20 = spop %165 }
 0x24f   :  { %v139_v31 = vstv %s166_s20 }
 0x250   :  { %v140_v32 = vmul.f32 0.125, %v139_v31 }
 0x252   :  { %142 = vst.msk [vmem:[#allocation9] sm:$0x1] %vm141_vm1, %v140_v32 }
 0x253   :  { %253 = shalt.err (!%p250_p0)
}
 0x254   :  { %s254_s25 = scalar_lea.hbm %s351_s3, 16 }
 0x255   :  { %p255_p1 = scmp.ne.s32.totalorder %s351_s3, %s254_s25  ;;  %p258_p2 = scmp.lt.u32.totalorder %s254_s25, %s351_s3 }
 0x257   :  { %p260_p3 = pnand %p258_p2, %p255_p1 }
 0x259   :  { %263 = shalt.err (!%p260_p3)
}
 0x25a   :  { %152 = dma.vmem_to_hbm [thread:$0]  %s150_s19, 16, %s351_s3, [#allocation5]  }
 0x25b   :  { %268 = dma.done.wait [#allocation5], 16  }
 0x25c   :  { %269 = vsyncadd [#allocation5], 4294967280 }
 0x25d   :  { %156 = vsyncpa [#allocation4], 1 }
 0x25e   :  { %157 = vsyncpa [#allocation7], 1 }
 0x25f   :  { %158 = vsyncpa [#allocation5], 1 }

</bundles_post_ra>
